<compile_context>
chip_gen: v7x
topology: tpu7x:2x2x1
jax: 0.10.0
libtpu: 0.0.40
codegen_flags: <defaults>
</compile_context>

<pallas_src>
import functools

import jax
import jax.numpy as jnp
from jax.experimental import pallas as pl
from jax.experimental.pallas import tpu as pltpu


# ----------------------------------------------------------------------------
# Fused Pallas kernel: full WiredCfCCell step (all layers chained in-kernel)
# ----------------------------------------------------------------------------
def _wired_cfc_kernel(layer_sizes, x_ref, hx_ref, ts_ref, *refs):
    """refs = [w_in_0, w_rec_0, b_0, ..., state_out_ref, last_out_ref]."""
    state_ref, last_ref = refs[-2], refs[-1]
    param_refs = refs[:-2]

    ts = ts_ref[...]                     # (B, 1), broadcasts over lanes
    x = x_ref[...]                       # (B, sensory)

    new_hs = []
    offset = 0
    h = None
    for li, H in enumerate(layer_sizes):
        w_in = param_refs[3 * li][...]       # (in_feat, 4H), mask pre-folded
        w_rec = param_refs[3 * li + 1][...]  # (H, 4H)
        b = param_refs[3 * li + 2][...]      # (1, 4H)

        h_prev = hx_ref[:, offset:offset + H]            # static VMEM slice

        # Single fused pre-activation slab: [ff1 | ff2 | t_a | t_b]
        pre = (jnp.dot(x, w_in, preferred_element_type=jnp.float32)
               + jnp.dot(h_prev, w_rec, preferred_element_type=jnp.float32)
               + b)                                       # (B, 4H)

        act = jnp.tanh(pre[:, 0:2 * H])                   # one EUP push for ff1|ff2
        ff1 = act[:, 0:H]
        ff2 = act[:, H:2 * H]

        # time gates are NOT sparsity-masked (matches ncps CfCCell)
        t_interp = jax.nn.sigmoid(pre[:, 2 * H:3 * H] * ts + pre[:, 3 * H:4 * H])
        # ff1*(1-t) + t*ff2  ==  ff1 + t*(ff2-ff1)
        h = ff1 + t_interp * (ff2 - ff1)

        new_hs.append(h)
        x = h                                  # feeds the next wired layer
        offset += H

    # One lane-dense store of the full new state + the last-layer output.
    state_ref[...] = jnp.concatenate(new_hs, axis=1).astype(state_ref.dtype)
    last_ref[...] = h.astype(last_ref.dtype)


def wired_cfc_forward(inputs, hx, timespans, layer_params, layer_sizes):
    """WiredCfCCell.forward: returns (h_last_layer, full_new_state)."""
    B = inputs.shape[0]
    state_size = sum(layer_sizes)
    last_h = layer_sizes[-1]
    vmem = pl.BlockSpec(memory_space=pltpu.MemorySpace.VMEM)

    flat_params = []
    for p in layer_params:
        flat_params += [p["w_in"], p["w_rec"], p["b"]]

    new_state, h_last = pl.pallas_call(
        functools.partial(_wired_cfc_kernel, tuple(layer_sizes)),
        out_shape=(jax.ShapeDtypeStruct((B, state_size), jnp.float32),
                   jax.ShapeDtypeStruct((B, last_h), jnp.float32)),
        in_specs=[vmem] * (3 + len(flat_params)),
        out_specs=(vmem, vmem),
    )(inputs, hx, timespans, *flat_params)

    return h_last, new_state


# ----------------------------------------------------------------------------
# Pure-JAX reference (same math, for correctness check)
# ----------------------------------------------------------------------------
def wired_cfc_reference(inputs, hx, timespans, layer_params, layer_sizes):
    x = inputs
    offset = 0
    new_hs = []
    for H, p in zip(layer_sizes, layer_params):
        h_prev = hx[:, offset:offset + H]
        pre = (jnp.dot(x, p["w_in"], preferred_element_type=jnp.float32)
               + jnp.dot(h_prev, p["w_rec"], preferred_element_type=jnp.float32)
               + p["b"])
        ff1 = jnp.tanh(pre[:, 0:H])
        ff2 = jnp.tanh(pre[:, H:2 * H])
        t_interp = jax.nn.sigmoid(pre[:, 2 * H:3 * H] * timespans
                                  + pre[:, 3 * H:4 * H])
        h = ff1 * (1.0 - t_interp) + t_interp * ff2
        new_hs.append(h)
        x = h
        offset += H
    new_state = jnp.concatenate(new_hs, axis=1)
    return x, new_state


# ----------------------------------------------------------------------------
# Deterministic synthetic wiring + parameter initialization
# ----------------------------------------------------------------------------
def build_wiring_masks(key, sensory_size, layer_sizes):
    """Synthetic wiring: adjacency entries in {-1,0,1}; input-part mask = |adj|.

    The recurrent block of the ncps mask is all ones, so it is a no-op and
    dropped here (mask folding only touches the input rows of w1/w2).
    """
    masks = []
    in_feat = sensory_size
    for h in layer_sizes:
        key, sub = jax.random.split(key)
        sparsity = jax.random.randint(sub, (in_feat, h), -1, 2)   # {-1, 0, 1}
        masks.append(jnp.abs(sparsity).astype(jnp.float32))       # (in_feat, h)
        in_feat = h
    return masks


def init_layer_params(key, sensory_size, layer_sizes, masks):
    """torch.nn.Linear-style init, then fold mask + fuse the four Linears."""
    params = []
    in_feat = sensory_size
    for li, h in enumerate(layer_sizes):
        F = in_feat + h                          # cat_shape = input + hidden
        bound = 1.0 / jnp.sqrt(jnp.float32(F))
        raw = {}
        for name in ("w1", "w2", "wa", "wb"):
            key, sub = jax.random.split(key)
            raw[name] = jax.random.uniform(sub, (F, h), jnp.float32, -bound, bound)
        for name in ("b1", "b2", "ba", "bb"):
            key, sub = jax.random.split(key)
            raw[name] = jax.random.uniform(sub, (1, h), jnp.float32, -bound, bound)

        # Fold sparsity mask into ff1/ff2 weights (input rows only).
        mask_in = masks[li]                                  # (in_feat, h)
        w1 = raw["w1"].at[:in_feat].multiply(mask_in)
        w2 = raw["w2"].at[:in_feat].multiply(mask_in)

        # Fuse [ff1 | ff2 | t_a | t_b] into one (F, 4h) weight and (1, 4h) bias,
        # then split into input/recurrent parts so no concat is needed at runtime.
        w_cat = jnp.concatenate([w1, w2, raw["wa"], raw["wb"]], axis=1)
        b_cat = jnp.concatenate([raw["b1"], raw["b2"], raw["ba"], raw["bb"]], axis=1)
        params.append({
            "w_in": w_cat[:in_feat],     # (in_feat, 4h)
            "w_rec": w_cat[in_feat:],    # (h, 4h)
            "b": b_cat,                  # (1, 4h)
        })
        in_feat = h
    return params


if __name__ == "__main__":
    # Small, deterministic example: NCP-like wiring with 3 layers.
    B = 4
    SENSORY = 8                      # wiring.input_dim
    LAYER_SIZES = [16, 16, 8]        # inter / command / motor neurons
    STATE_SIZE = sum(LAYER_SIZES)    # wiring.units = 40

    key = jax.random.PRNGKey(0)
    k_mask, k_param, k_x, k_h, k_t = jax.random.split(key, 5)

    masks = build_wiring_masks(k_mask, SENSORY, LAYER_SIZES)
    layer_params = init_layer_params(k_param, SENSORY, LAYER_SIZES, masks)

    x = jax.random.normal(k_x, (B, SENSORY), jnp.float32)
    hx = jax.random.normal(k_h, (B, STATE_SIZE), jnp.float32)
    ts = jax.random.uniform(k_t, (B, 1), jnp.float32, 0.5, 1.5)   # timespans

    fwd = jax.jit(functools.partial(wired_cfc_forward,
                                    layer_params=layer_params,
                                    layer_sizes=LAYER_SIZES))
    h_last, new_state = fwd(x, hx, ts)
    jax.block_until_ready((h_last, new_state))

    # Correctness check against a pure-JAX reference of the same math.
    h_ref, state_ref = wired_cfc_reference(x, hx, ts, layer_params, LAYER_SIZES)

    assert h_last.shape == (B, LAYER_SIZES[-1])
    assert new_state.shape == (B, STATE_SIZE)
    assert bool(jnp.all(jnp.isfinite(h_last))) and bool(jnp.all(jnp.isfinite(new_state)))
    assert bool(jnp.allclose(new_state, state_ref, rtol=1e-3, atol=1e-3))
    assert bool(jnp.allclose(h_last, h_ref, rtol=1e-3, atol=1e-3))
    print("KERNEL_OK")
</pallas_src>

<mosaic_0001>
module attributes {stable_mosaic.version = 11 : i64} {
  func.func @_wired_cfc_kernel(%arg0: memref<4x8xf32, #tpu.memory_space<vmem>>, %arg1: memref<4x40xf32, #tpu.memory_space<vmem>>, %arg2: memref<4x1xf32, #tpu.memory_space<vmem>>, %arg3: memref<8x64xf32, #tpu.memory_space<vmem>>, %arg4: memref<16x64xf32, #tpu.memory_space<vmem>>, %arg5: memref<1x64xf32, #tpu.memory_space<vmem>>, %arg6: memref<16x64xf32, #tpu.memory_space<vmem>>, %arg7: memref<16x64xf32, #tpu.memory_space<vmem>>, %arg8: memref<1x64xf32, #tpu.memory_space<vmem>>, %arg9: memref<16x32xf32, #tpu.memory_space<vmem>>, %arg10: memref<8x32xf32, #tpu.memory_space<vmem>>, %arg11: memref<1x32xf32, #tpu.memory_space<vmem>>, %arg12: memref<4x40xf32, #tpu.memory_space<vmem>>, %arg13: memref<4x8xf32, #tpu.memory_space<vmem>>) attributes {dimension_semantics = [], scalar_prefetch = 0 : i64, scratch_operands = 0 : i64, tpu.core_type = #tpu.core_type<tc>} {
    %c0 = arith.constant 0 : index
    %c0_0 = arith.constant 0 : index
    %0 = vector.load %arg2[%c0, %c0_0] : memref<4x1xf32, #tpu.memory_space<vmem>>, vector<4x1xf32>
    %c0_1 = arith.constant 0 : index
    %c0_2 = arith.constant 0 : index
    %1 = vector.load %arg0[%c0_1, %c0_2] : memref<4x8xf32, #tpu.memory_space<vmem>>, vector<4x8xf32>
    %c0_3 = arith.constant 0 : index
    %c0_4 = arith.constant 0 : index
    %2 = vector.load %arg3[%c0_3, %c0_4] : memref<8x64xf32, #tpu.memory_space<vmem>>, vector<8x64xf32>
    %c0_5 = arith.constant 0 : index
    %c0_6 = arith.constant 0 : index
    %3 = vector.load %arg4[%c0_5, %c0_6] : memref<16x64xf32, #tpu.memory_space<vmem>>, vector<16x64xf32>
    %c0_7 = arith.constant 0 : index
    %c0_8 = arith.constant 0 : index
    %4 = vector.load %arg5[%c0_7, %c0_8] : memref<1x64xf32, #tpu.memory_space<vmem>>, vector<1x64xf32>
    %c0_9 = arith.constant 0 : index
    %c0_10 = arith.constant 0 : index
    %5 = vector.load %arg1[%c0_9, %c0_10] : memref<4x40xf32, #tpu.memory_space<vmem>>, vector<4x16xf32>
    %cst = arith.constant dense<0.000000e+00> : vector<4x64xf32>
    %6 = tpu.matmul %1, %2, %cst {dimension_numbers = #tpu.dot_dimension_numbers<[1], [0], [0], [1], [0, 0, 1, 1], [], []>} : vector<4x8xf32>, vector<8x64xf32>, vector<4x64xf32> -> vector<4x64xf32>
    %cst_11 = arith.constant dense<0.000000e+00> : vector<4x64xf32>
    %7 = tpu.matmul %5, %3, %cst_11 {dimension_numbers = #tpu.dot_dimension_numbers<[1], [0], [0], [1], [0, 0, 1, 1], [], []>} : vector<4x16xf32>, vector<16x64xf32>, vector<4x64xf32> -> vector<4x64xf32>
    %8 = arith.addf %6, %7 : vector<4x64xf32>
    %9 = vector.broadcast %4 : vector<1x64xf32> to vector<4x64xf32>
    %10 = arith.addf %8, %9 : vector<4x64xf32>
    %11 = vector.extract_strided_slice %10 {offsets = [0, 0], sizes = [4, 32], strides = [1, 1]} : vector<4x64xf32> to vector<4x32xf32>
    %12 = math.tanh %11 : vector<4x32xf32>
    %13 = vector.extract_strided_slice %12 {offsets = [0, 0], sizes = [4, 16], strides = [1, 1]} : vector<4x32xf32> to vector<4x16xf32>
    %14 = vector.extract_strided_slice %12 {offsets = [0, 16], sizes = [4, 16], strides = [1, 1]} : vector<4x32xf32> to vector<4x16xf32>
    %15 = vector.extract_strided_slice %10 {offsets = [0, 32], sizes = [4, 16], strides = [1, 1]} : vector<4x64xf32> to vector<4x16xf32>
    %16 = vector.broadcast %0 : vector<4x1xf32> to vector<4x16xf32>
    %17 = arith.mulf %15, %16 : vector<4x16xf32>
    %18 = vector.extract_strided_slice %10 {offsets = [0, 48], sizes = [4, 16], strides = [1, 1]} : vector<4x64xf32> to vector<4x16xf32>
    %19 = arith.addf %17, %18 : vector<4x16xf32>
    %20 = arith.negf %19 : vector<4x16xf32>
    %21 = math.exp %20 : vector<4x16xf32>
    %cst_12 = arith.constant 1.000000e+00 : f32
    %22 = vector.broadcast %cst_12 : f32 to vector<4x16xf32>
    %23 = arith.addf %22, %21 : vector<4x16xf32>
    %24 = arith.divf %22, %23 : vector<4x16xf32>
    %25 = arith.subf %14, %13 : vector<4x16xf32>
    %26 = arith.mulf %24, %25 : vector<4x16xf32>
    %27 = arith.addf %13, %26 : vector<4x16xf32>
    %c0_13 = arith.constant 0 : index
    %c0_14 = arith.constant 0 : index
    %28 = vector.load %arg6[%c0_13, %c0_14] : memref<16x64xf32, #tpu.memory_space<vmem>>, vector<16x64xf32>
    %c0_15 = arith.constant 0 : index
    %c0_16 = arith.constant 0 : index
    %29 = vector.load %arg7[%c0_15, %c0_16] : memref<16x64xf32, #tpu.memory_space<vmem>>, vector<16x64xf32>
    %c0_17 = arith.constant 0 : index
    %c0_18 = arith.constant 0 : index
    %30 = vector.load %arg8[%c0_17, %c0_18] : memref<1x64xf32, #tpu.memory_space<vmem>>, vector<1x64xf32>
    %c0_19 = arith.constant 0 : index
    %c16 = arith.constant 16 : index
    %31 = vector.load %arg1[%c0_19, %c16] : memref<4x40xf32, #tpu.memory_space<vmem>>, vector<4x16xf32>
    %cst_20 = arith.constant dense<0.000000e+00> : vector<4x64xf32>
    %32 = tpu.matmul %27, %28, %cst_20 {dimension_numbers = #tpu.dot_dimension_numbers<[1], [0], [0], [1], [0, 0, 1, 1], [], []>} : vector<4x16xf32>, vector<16x64xf32>, vector<4x64xf32> -> vector<4x64xf32>
    %cst_21 = arith.constant dense<0.000000e+00> : vector<4x64xf32>
    %33 = tpu.matmul %31, %29, %cst_21 {dimension_numbers = #tpu.dot_dimension_numbers<[1], [0], [0], [1], [0, 0, 1, 1], [], []>} : vector<4x16xf32>, vector<16x64xf32>, vector<4x64xf32> -> vector<4x64xf32>
    %34 = arith.addf %32, %33 : vector<4x64xf32>
    %35 = vector.broadcast %30 : vector<1x64xf32> to vector<4x64xf32>
    %36 = arith.addf %34, %35 : vector<4x64xf32>
    %37 = vector.extract_strided_slice %36 {offsets = [0, 0], sizes = [4, 32], strides = [1, 1]} : vector<4x64xf32> to vector<4x32xf32>
    %38 = math.tanh %37 : vector<4x32xf32>
    %39 = vector.extract_strided_slice %38 {offsets = [0, 0], sizes = [4, 16], strides = [1, 1]} : vector<4x32xf32> to vector<4x16xf32>
    %40 = vector.extract_strided_slice %38 {offsets = [0, 16], sizes = [4, 16], strides = [1, 1]} : vector<4x32xf32> to vector<4x16xf32>
    %41 = vector.extract_strided_slice %36 {offsets = [0, 32], sizes = [4, 16], strides = [1, 1]} : vector<4x64xf32> to vector<4x16xf32>
    %42 = vector.broadcast %0 : vector<4x1xf32> to vector<4x16xf32>
    %43 = arith.mulf %41, %42 : vector<4x16xf32>
    %44 = vector.extract_strided_slice %36 {offsets = [0, 48], sizes = [4, 16], strides = [1, 1]} : vector<4x64xf32> to vector<4x16xf32>
    %45 = arith.addf %43, %44 : vector<4x16xf32>
    %46 = arith.negf %45 : vector<4x16xf32>
    %47 = math.exp %46 : vector<4x16xf32>
    %cst_22 = arith.constant 1.000000e+00 : f32
    %48 = vector.broadcast %cst_22 : f32 to vector<4x16xf32>
    %49 = arith.addf %48, %47 : vector<4x16xf32>
    %50 = arith.divf %48, %49 : vector<4x16xf32>
    %51 = arith.subf %40, %39 : vector<4x16xf32>
    %52 = arith.mulf %50, %51 : vector<4x16xf32>
    %53 = arith.addf %39, %52 : vector<4x16xf32>
    %c0_23 = arith.constant 0 : index
    %c0_24 = arith.constant 0 : index
    %54 = vector.load %arg9[%c0_23, %c0_24] : memref<16x32xf32, #tpu.memory_space<vmem>>, vector<16x32xf32>
    %c0_25 = arith.constant 0 : index
    %c0_26 = arith.constant 0 : index
    %55 = vector.load %arg10[%c0_25, %c0_26] : memref<8x32xf32, #tpu.memory_space<vmem>>, vector<8x32xf32>
    %c0_27 = arith.constant 0 : index
    %c0_28 = arith.constant 0 : index
    %56 = vector.load %arg11[%c0_27, %c0_28] : memref<1x32xf32, #tpu.memory_space<vmem>>, vector<1x32xf32>
    %c0_29 = arith.constant 0 : index
    %c32 = arith.constant 32 : index
    %57 = vector.load %arg1[%c0_29, %c32] : memref<4x40xf32, #tpu.memory_space<vmem>>, vector<4x8xf32>
    %cst_30 = arith.constant dense<0.000000e+00> : vector<4x32xf32>
    %58 = tpu.matmul %53, %54, %cst_30 {dimension_numbers = #tpu.dot_dimension_numbers<[1], [0], [0], [1], [0, 0, 1, 1], [], []>} : vector<4x16xf32>, vector<16x32xf32>, vector<4x32xf32> -> vector<4x32xf32>
    %cst_31 = arith.constant dense<0.000000e+00> : vector<4x32xf32>
    %59 = tpu.matmul %57, %55, %cst_31 {dimension_numbers = #tpu.dot_dimension_numbers<[1], [0], [0], [1], [0, 0, 1, 1], [], []>} : vector<4x8xf32>, vector<8x32xf32>, vector<4x32xf32> -> vector<4x32xf32>
    %60 = arith.addf %58, %59 : vector<4x32xf32>
    %61 = vector.broadcast %56 : vector<1x32xf32> to vector<4x32xf32>
    %62 = arith.addf %60, %61 : vector<4x32xf32>
    %63 = vector.extract_strided_slice %62 {offsets = [0, 0], sizes = [4, 16], strides = [1, 1]} : vector<4x32xf32> to vector<4x16xf32>
    %64 = math.tanh %63 : vector<4x16xf32>
    %65 = vector.extract_strided_slice %64 {offsets = [0, 0], sizes = [4, 8], strides = [1, 1]} : vector<4x16xf32> to vector<4x8xf32>
    %66 = vector.extract_strided_slice %64 {offsets = [0, 8], sizes = [4, 8], strides = [1, 1]} : vector<4x16xf32> to vector<4x8xf32>
    %67 = vector.extract_strided_slice %62 {offsets = [0, 16], sizes = [4, 8], strides = [1, 1]} : vector<4x32xf32> to vector<4x8xf32>
    %68 = vector.broadcast %0 : vector<4x1xf32> to vector<4x8xf32>
    %69 = arith.mulf %67, %68 : vector<4x8xf32>
    %70 = vector.extract_strided_slice %62 {offsets = [0, 24], sizes = [4, 8], strides = [1, 1]} : vector<4x32xf32> to vector<4x8xf32>
    %71 = arith.addf %69, %70 : vector<4x8xf32>
    %72 = arith.negf %71 : vector<4x8xf32>
    %73 = math.exp %72 : vector<4x8xf32>
    %cst_32 = arith.constant 1.000000e+00 : f32
    %74 = vector.broadcast %cst_32 : f32 to vector<4x8xf32>
    %75 = arith.addf %74, %73 : vector<4x8xf32>
    %76 = arith.divf %74, %75 : vector<4x8xf32>
    %77 = arith.subf %66, %65 : vector<4x8xf32>
    %78 = arith.mulf %76, %77 : vector<4x8xf32>
    %79 = arith.addf %65, %78 : vector<4x8xf32>
    %80 = tpu.concatenate %27, %53, %79 in 1 : vector<4x16xf32>, vector<4x16xf32>, vector<4x8xf32> -> vector<4x40xf32>
    %c0_33 = arith.constant 0 : index
    %c0_34 = arith.constant 0 : index
    %81 = vector.load %arg12[%c0_33, %c0_34] : memref<4x40xf32, #tpu.memory_space<vmem>>, vector<4x40xf32>
    tpu.vector_store %arg12[%c0_33, %c0_34], %80 {strides = array<i32>} : memref<4x40xf32, #tpu.memory_space<vmem>>, vector<4x40xf32>,
    %c0_35 = arith.constant 0 : index
    %c0_36 = arith.constant 0 : index
    %82 = vector.load %arg13[%c0_35, %c0_36] : memref<4x8xf32, #tpu.memory_space<vmem>>, vector<4x8xf32>
    tpu.vector_store %arg13[%c0_35, %c0_36], %79 {strides = array<i32>} : memref<4x8xf32, #tpu.memory_space<vmem>>, vector<4x8xf32>,
    return
  }
}

</mosaic_0001>

<bundles_post_ra>
// kernel: wired_cfc_forward.1
= control target key start
LH: loop header
LB: loop body
LE: loop exit
PB: predicated region body
PF: predicated region fallthrough
CT: control target
= control target key end

     0   :  { %19 = vsyncpa [#allocation3], 0  ;;  %s1255_s0 = inlined_call_operand.vmem [shape: f32[4,8], index: 0, kind: input, shape index: {}]   ;;  %s1256_s1 = inlined_call_operand.hbm [shape: f32[4,40], index: 1, kind: input, shape index: {}]   ;;  %s1257_s2 = inlined_call_operand.vmem [shape: f32[4,1], index: 2, kind: input, shape index: {}]   ;;  %s1258_s3 = inlined_call_operand.hbm [shape: f32[8,64], index: 3, kind: input, shape index: {}]   ;;  %s1259_s4 = inlined_call_operand.hbm [shape: f32[16,64], index: 4, kind: input, shape index: {}]   ;;  %s1260_s5 = inlined_call_operand.vmem [shape: f32[1,64], index: 5, kind: input, shape index: {}]   ;;  %s1261_s6 = inlined_call_operand.hbm [shape: f32[16,64], index: 6, kind: input, shape index: {}]   ;;  %s1262_s7 = inlined_call_operand.hbm [shape: f32[16,64], index: 7, kind: input, shape index: {}]   ;;  %s1263_s8 = inlined_call_operand.vmem [shape: f32[1,64], index: 8, kind: input, shape index: {}]   ;;  %s1264_s9 = inlined_call_operand.vmem [shape: f32[16,32], index: 9, kind: input, shape index: {}]   ;;  %s1265_s10 = inlined_call_operand.vmem [shape: f32[8,32], index: 10, kind: input, shape index: {}]   ;;  %s1266_s11 = inlined_call_operand.vmem [shape: f32[1,32], index: 11, kind: input, shape index: {}]   ;;  %s1267_s12 = inlined_call_operand.hbm [shape: f32[4,40], index: 12, kind: output, shape index: {0}]   ;;  %s1268_s13 = inlined_call_operand.hbm [shape: f32[4,8], index: 13, kind: output, shape index: {1}]  }
   0x1   :  { %20 = vsyncpa [#allocation6], 0 }
   0x2   :  { %21 = vsyncpa [#allocation9], 0 }
   0x3   :  { %22 = vsyncpa [#allocation4], 0 }
   0x4   :  { %23 = vsyncpa [#allocation13], 0  ;;  %s1001_s25 = smov [#allocation5]   ;;  %s837_s29 = scalar_lea.hbm %s1258_s3, 128 }
   0x5   :  { %s44_s26 = sshll.u32 %s1001_s25, 4  ;;  %p838_p0 = scmp.ne.s32.totalorder %s1258_s3, %s837_s29  ;;  %s45_s26 = int_to_ptr.vmem [resolvable:$true] %s44_s26 }
   0x6   :  { %p841_p1 = scmp.lt.u32.totalorder %s837_s29, %s1258_s3 }
   0x8   :  { %p843_p2 = pnand %p841_p1, %p838_p0 }
   0xa   :  { %846 = shalt.err (!%p843_p2)
}
   0xb   :  { %s847_s17 = scalar_lea.vmem %s45_s26, 128  ;;  %p852_p4 = scmp.lt.s32.totalorder %s45_s26, %s45_s26 }
   0xc   :  { %p848_p3 = scmp.ne.s32.totalorder %s45_s26, %s847_s17  ;;  %p853_p5 = scmp.lt.s32.totalorder %s847_s17, %s847_s17 }
   0xe   :  { %p854_p6 = por %p853_p5, %p852_p4 }
  0x10   :  { %p855_p7 = pnand %p854_p6, %p848_p3 }
  0x12   :  { %858 = shalt.err (!%p855_p7)
}
  0x13   :  { %47 = dma.hbm_to_vmem [thread:$0]  %s1258_s3, 128, %s45_s26, [#allocation6]  }
  0x14   :  { %s1002_s20 = smov [#allocation8]   ;;  %s1003_s22 = smov [#allocation2]  }
  0x15   :  { %s67_s21 = sshll.u32 %s1002_s20, 4  ;;  %s32_s23 = sshll.u32 %s1003_s22, 4  ;;  %s68_s21 = int_to_ptr.vmem [resolvable:$true] %s67_s21  ;;  %s33_s23 = int_to_ptr.vmem [resolvable:$true] %s32_s23 }
  0x16   :  { %s859_s27 = scalar_lea.hbm %s1261_s6, 256 }
  0x17   :  { %p860_p8 = scmp.ne.s32.totalorder %s1261_s6, %s859_s27  ;;  %p863_p9 = scmp.lt.u32.totalorder %s859_s27, %s1261_s6 }
  0x19   :  { %p865_p10 = pnand %p863_p9, %p860_p8 }
  0x1b   :  { %868 = shalt.err (!%p865_p10)
}
  0x1c   :  { %s869_s3 = scalar_lea.vmem %s68_s21, 256  ;;  %p874_p12 = scmp.lt.s32.totalorder %s68_s21, %s68_s21 }
  0x1d   :  { %p870_p11 = scmp.ne.s32.totalorder %s68_s21, %s869_s3  ;;  %p875_p13 = scmp.lt.s32.totalorder %s869_s3, %s869_s3 }
  0x1f   :  { %p876_p0 = por %p875_p13, %p874_p12 }
  0x21   :  { %p877_p1 = pnand %p876_p0, %p870_p11 }
  0x23   :  { %880 = shalt.err (!%p877_p1)
}
  0x24   :  { %s1004_s26 = smov 128   ;;  %s1005_s15 = smov 8  }
  0x25   :  { %73 = dma.hbm_to_vmem [thread:$0]  %s1261_s6, 256, %s68_s21, [#allocation9], %s1004_s26, %s1004_s26, %s1005_s15  }
  0x26   :  { %s881_s20 = scalar_lea.hbm %s1256_s1, 64 }
  0x27   :  { %p882_p2 = scmp.ne.s32.totalorder %s1256_s1, %s881_s20  ;;  %p885_p3 = scmp.lt.u32.totalorder %s881_s20, %s1256_s1 }
  0x29   :  { %p887_p4 = pnand %p885_p3, %p882_p2 }
  0x2b   :  { %890 = shalt.err (!%p887_p4)
}
  0x2c   :  { %s891_s28 = scalar_lea.vmem %s33_s23, 64  ;;  %p896_p6 = scmp.lt.s32.totalorder %s33_s23, %s33_s23 }
  0x2d   :  { %p892_p5 = scmp.ne.s32.totalorder %s33_s23, %s891_s28  ;;  %p897_p7 = scmp.lt.s32.totalorder %s891_s28, %s891_s28 }
  0x2f   :  { %p898_p8 = por %p897_p7, %p896_p6 }
  0x31   :  { %p899_p9 = pnand %p898_p8, %p892_p5 }
  0x33   :  { %902 = shalt.err (!%p899_p9)
}
  0x34   :  { %35 = dma.hbm_to_vmem [thread:$0]  %s1256_s1, 64, %s33_s23, [#allocation3]  }
  0x35   :  { %s1006_s29 = smov [#allocation7]   ;;  %s1007_s14 = smov [#allocation10]  }
  0x36   :  { %s53_s30 = sshll.u32 %s1006_s29, 4  ;;  %s79_s3 = sshll.u32 %s1007_s14, 4  ;;  %s54_s30 = int_to_ptr.vmem [resolvable:$true] %s53_s30  ;;  %s80_s3 = int_to_ptr.vmem [resolvable:$true] %s79_s3 }
  0x37   :  { %s903_s18 = scalar_lea.hbm %s1259_s4, 256 }
  0x38   :  { %p904_p10 = scmp.ne.s32.totalorder %s1259_s4, %s903_s18  ;;  %p907_p11 = scmp.lt.u32.totalorder %s903_s18, %s1259_s4 }
  0x3a   :  { %p909_p12 = pnand %p907_p11, %p904_p10 }
  0x3c   :  { %912 = shalt.err (!%p909_p12)
}
  0x3d   :  { %s913_s1 = scalar_lea.vmem %s54_s30, 256  ;;  %p918_p0 = scmp.lt.s32.totalorder %s54_s30, %s54_s30 }
  0x3e   :  { %p914_p13 = scmp.ne.s32.totalorder %s54_s30, %s913_s1  ;;  %p919_p1 = scmp.lt.s32.totalorder %s913_s1, %s913_s1 }
  0x40   :  { %p920_p2 = por %p919_p1, %p918_p0 }
  0x42   :  { %p921_p3 = pnand %p920_p2, %p914_p13 }
  0x44   :  { %924 = shalt.err (!%p921_p3)
}
  0x45   :  { %59 = dma.hbm_to_vmem [thread:$0]  %s1259_s4, 256, %s54_s30, [#allocation6], %s1004_s26, %s1004_s26, %s1005_s15  }
  0x46   :  { %s925_s6 = scalar_lea.hbm %s1262_s7, 256 }
  0x47   :  { %p926_p4 = scmp.ne.s32.totalorder %s1262_s7, %s925_s6  ;;  %p929_p5 = scmp.lt.u32.totalorder %s925_s6, %s1262_s7 }
  0x49   :  { %p931_p6 = pnand %p929_p5, %p926_p4 }
  0x4b   :  { %934 = shalt.err (!%p931_p6)
}
  0x4c   :  { %s935_s17 = scalar_lea.vmem %s80_s3, 256  ;;  %p940_p8 = scmp.lt.s32.totalorder %s80_s3, %s80_s3 }
  0x4d   :  { %p936_p7 = scmp.ne.s32.totalorder %s80_s3, %s935_s17  ;;  %p941_p9 = scmp.lt.s32.totalorder %s935_s17, %s935_s17 }
  0x4f   :  { %p942_p10 = por %p941_p9, %p940_p8 }
  0x51   :  { %p943_p11 = pnand %p942_p10, %p936_p7 }
  0x53   :  { %946 = shalt.err (!%p943_p11)
}
  0x54   :  { %85 = dma.hbm_to_vmem [thread:$0]  %s1262_s7, 256, %s80_s3, [#allocation9], %s1004_s26, %s1004_s26, %s1005_s15  }
  0x55   :  { %991 = dma.done.wait [#allocation3], 64  }
  0x56   :  { %992 = vsyncadd [#allocation3], 4294967232 }
  0x57   :  { %993 = dma.done.wait [#allocation6], 384  }
  0x58   :  { %994 = vsyncadd [#allocation6], 4294966912 }
  0x59   :  { %995 = dma.done.wait [#allocation9], 512  }
  0x5a   :  { %996 = vsyncadd [#allocation9], 4294966784  ;;  %v1008_v0 = vmov 0.0|0.0   ;;  %v1009_v1 = vmov 0.0   ;;  %vm1010_vm0 = vmmov 0   ;;  %vm190_vm1 = vcmask 64512  }
  0x5b   :  { %788 = vmatprep.subr.bf16.mxu0 %v1008_v0  ;;  %757 = vmatprep.subr.mxu1 %v1009_v1  ;;  %v112_v2 = vld [vmem:[#allocation7] sm:$0xff]  ;;  %v113_v3 = vld [vmem:[#allocation7 + $0x8] sm:$0xff]  ;;  %v111_v4 = vld [vmem:[#allocation5] sm:$0xff]  ;;  %vm116_vm2 = vcmask 130048   ;;  %v1011_v8 = vmov 0   ;;  %s1012_s18 = smov 112  }
  0x5c   :  { %759 = vmatprep.mubr.msk.f32.mxu1 %vm1010_vm0, %v1009_v1  ;;  %754 = vmatprep.mubr.msk.f32.mxu0 %vm1010_vm0, %v1009_v1  ;;  %v789_v5 = vpack.c.bf16 %v113_v3, %v112_v2  ;;  %v110_v6 = vld [vmem:[%s1255_s0] sm:$0xf]  ;;  %s1013_s19 = smov 16   ;;  %v306_v18 = vld [vmem:[#allocation10] sm:$0xff]  ;;  %v307_v19 = vld [vmem:[#allocation10 + $0x8] sm:$0xff]  ;;  %s1015_s6 = smov 120  }
  0x5d   :  { %758 = vmatpush3.msra.mxu1 %v111_v4  ;;  %v1167_v7 = vld [vmem:[#allocation2] sm:$0xf]  ;;  %818 = vset.pattern.permute.xlu0 %v1011_v8  ;;  %v792_v21 = vpack.c.bf16 %v307_v19, %v306_v18  ;;  %v305_v22 = vld [vmem:[#allocation8 + $0x8] sm:$0xff]  ;;  %vm689_vm3 = vcmask 60416  }
  0x5e   :  { %760 = vmatmul.mubr.msk.f32.vlgmr.msra.gmra.mrb[0].mxu1 %vm190_vm1, %v110_v6  ;;  %791 = vmatprep.subr.bf16.mxu1 %v1008_v0  ;;  %v724_v11 = vld [vmem:[%s1260_s5] ss:$0 sm:$0xff]  ;;  %v492_v49 = vld [vmem:[%s1264_s9 + $0x8] sm:$0xff] }
  0x5f   :  { %790 = vmatpush3.bf16.msra.mxu0 %v789_v5  ;;  %766 = vmatprep.mubr.msk.f32.mxu1 %vm1010_vm0, %v1009_v1  ;;  %v109_v17 = vld [vmem:[%s1257_s2] sm:$0xf]  ;;  %s1014_s2 = smov 96  }
  0x60   :  { %794 = vmatprep.subr.bf16.mxu0 %v1008_v0  ;;  %v304_v20 = vld [vmem:[#allocation8] sm:$0xff]  ;;  %793 = vmatpush3.bf16.msra.mxu1 %v792_v21 }
  0x61   :  { %v795_v23 = vpack.c.bf16 %v305_v22, %v304_v20  ;;  %776 = vmatprep.subr.mxu1 %v1009_v1  ;;  %v728_v41 = vld [vmem:[%s1263_s8] ss:$0 sm:$0xff] }
  0x62   :  { %755 = vmatmul.mubr.msk.f32.vlgmr.msra.gmra.mrb[0].mxu0 %vm116_vm2, %v1167_v7  ;;  %v493_v47 = vld [vmem:[%s1265_s10] sm:$0xff] }
  0x63   :  { %773 = vmatprep.mubr.msk.f32.mxu0 %vm1010_vm0, %v1009_v1  ;;  %796 = vmatpush3.bf16.msra.mxu0 %v795_v23  ;;  %v491_v48 = vld [vmem:[%s1264_s9] sm:$0xff] }
  0x64   :  { %797 = vmatprep.subr.bf16.mxu0 %v1008_v0  ;;  %v798_v50 = vpack.c.bf16 %v492_v49, %v491_v48  ;;  %v732_v3 = vld [vmem:[%s1266_s11] ss:$0 sm:$0xff]  ;;  %s1016_s11 = smov [#allocation12]  }
  0x65   :  { %s707_s21 = sshll.u32 %s1016_s11, 4  ;;  %s708_s21 = int_to_ptr.vmem [resolvable:$true] %s707_s21 }
  0x66   :  { %s947_s29 = scalar_lea.vmem %s708_s21, 64  ;;  %p952_p13 = scmp.lt.s32.totalorder %s708_s21, %s708_s21 }
  0x67   :  { %p948_p12 = scmp.ne.s32.totalorder %s708_s21, %s947_s29  ;;  %p953_p0 = scmp.lt.s32.totalorder %s947_s29, %s947_s29 }
  0x69   :  { %p954_p1 = por %p953_p0, %p952_p13 }
  0x6b   :  { %p955_p2 = pnand %p954_p1, %p948_p12 }
 0x131   :  { %v260_v9 = vpop.f32.mrb[0].mxu1 }
 0x132   :  { %v761_v10 = vpop.f32.mrb[1].mxu1 }
 0x135   :  { %v186_v12 = vpop.f32.mrb[0].mxu0 }
 0x136   :  { %v261_v13 = vadd.f32 %v260_v9, %v186_v12  ;;  %v756_v14 = vpop.f32.mrb[1].mxu0 }
 0x138   :  { %v270_v15 = vadd.f32 %v724_v11, %v261_v13 }
 0x13a   :  { %819 = vtanh.f32 %v270_v15  ;;  %279 = vrot.lane.b32.xlu1 %v270_v15, %s1012_s18 }
 0x144   :  { %v820_v16 = vpop.eup %819 }
 0x145   :  { %290 = vrot.lane.b32.xlu0 %v820_v16, %s1013_s19 }
 0x149   :  { %274 = vperm.xlu0 %818, %v109_v17  }
 0x14d   :  { %309 = vrot.lane.b32.xlu0 %v1167_v7, %s1012_s18 }
 0x1ac   :  { %v280_v28 = vpop.permute.xlu1 %279 }
 0x1b7   :  { %v291_v24 = vpop.permute.xlu0 %290 }
 0x1b8   :  { %v293_v25 = vsub.f32 %v820_v16, %v291_v24 }
 0x1ba   :  { %295 = vrot.lane.b32.xlu1 %v293_v25, %s1013_s19 }
 0x1c8   :  { %v1187_v26 = vpop.permute.xlu0 %274 }
 0x1c9   :  { %v277_v27 = vmul.f32 %v1187_v26, %v270_v15 }
 0x1cb   :  { %v282_v29 = vadd.f32 %v280_v28, %v277_v27 }
 0x1cc   :  { %v310_v33 = vpop.permute.xlu0 %309 }
 0x1cd   :  { %v725_v30 = vmul.f32 -1.442695, %v282_v29  ;;  %767 = vmatmul.mubr.msk.f32.vlgmr.msra.gmra.mrb[2].mxu1 %vm116_vm2, %v310_v33 }
 0x1ce   :  { %778 = vmatprep.mubr.msk.f32.mxu1 %vm1010_vm0, %v1009_v1  ;;  %777 = vmatpush3.msra.mxu1 %v493_v47 }
 0x1cf   :  { %821 = vpow2.f32 %v725_v30 }
 0x1d9   :  { %v822_v31 = vpop.eup %821 }
 0x1da   :  { %v286_v32 = vadd.f32 1.0, %v822_v31 }
 0x1dc   :  { %823 = vrcp.f32 %v286_v32 }
 0x1e6   :  { %v824_v34 = vpop.eup %823 }
 0x22c   :  { %v296_v35 = vpop.permute.xlu1 %295 }
 0x22d   :  { %v298_v36 = vmul.f32 %v824_v34, %v296_v35 }
 0x22f   :  { %300 = vrot.lane.b32.xlu1 %v298_v36, %s1014_s2 }
 0x2a0   :  { %v379_v39 = vpop.f32.mrb[2].mxu1 }
 0x2a1   :  { %v301_v37 = vpop.permute.xlu1 %300  ;;  %v768_v40 = vpop.f32.mrb[3].mxu1 }
 0x2a2   :  { %v1194_v38 = vadd.f32 %v820_v16, %v301_v37 }
 0x2a4   :  { %774 = vmatmul.mubr.msk.f32.vlgmr.msra.gmra.mrb[2].mxu0 %vm116_vm2, %v1194_v38 }
 0x2a5   :  { %785 = vmatprep.mubr.msk.f32.mxu0 %vm1010_vm0, %v1009_v1  ;;  %799 = vmatpush3.bf16.msra.mxu0 %v798_v50 }
 0x377   :  { %v452_v42 = vpop.f32.mrb[2].mxu0 }
 0x378   :  { %v453_v43 = vadd.f32 %v452_v42, %v379_v39  ;;  %v775_v44 = vpop.f32.mrb[3].mxu0 }
 0x37a   :  { %v462_v45 = vadd.f32 %v728_v41, %v453_v43 }
 0x37c   :  { %825 = vtanh.f32 %v462_v45  ;;  %466 = vrot.lane.b32.xlu0 %v462_v45, %s1012_s18  ;;  %v464_v54 = vmul.f32 %v462_v45, %v1187_v26 }
 0x386   :  { %v826_v46 = vpop.eup %825 }
 0x387   :  { %477 = vrot.lane.b32.xlu1 %v826_v46, %s1013_s19 }
 0x3ee   :  { %v467_v53 = vpop.permute.xlu0 %466 }
 0x3ef   :  { %v469_v55 = vadd.f32 %v467_v53, %v464_v54 }
 0x3f1   :  { %v729_v56 = vmul.f32 -1.442695, %v469_v55 }
 0x3f3   :  { %827 = vpow2.f32 %v729_v56 }
 0x3f9   :  { %v478_v51 = vpop.permute.xlu1 %477 }
 0x3fa   :  { %v480_v52 = vsub.f32 %v826_v46, %v478_v51 }
 0x3fc   :  { %482 = vrot.lane.b32.xlu1 %v480_v52, %s1013_s19 }
 0x3fd   :  { %v828_v57 = vpop.eup %827 }
 0x3fe   :  { %v473_v58 = vadd.f32 1.0, %v828_v57 }
 0x400   :  { %495 = vrot.lane.b32.xlu1 %v1167_v7, %s1014_s2  ;;  %829 = vrcp.f32 %v473_v58 }
 0x40a   :  { %v830_v59 = vpop.eup %829 }
 0x46e   :  { %v483_v60 = vpop.permute.xlu1 %482 }
 0x46f   :  { %v485_v61 = vmul.f32 %v830_v59, %v483_v60 }
 0x471   :  { %487 = vrot.lane.b32.xlu0 %v485_v61, %s1014_s2 }
 0x472   :  { %v496_v62 = vpop.permute.xlu1 %495 }
 0x473   :  { %779 = vmatmul.mubr.msk.f32.vlgmr.msra.gmra.mrb[4].mxu1 %vm190_vm1, %v496_v62 }
 0x4e3   :  { %v488_v63 = vpop.permute.xlu0 %487 }
 0x4e4   :  { %v490_v0 = vadd.f32 %v826_v46, %v488_v63 }
 0x4e6   :  { %786 = vmatmul.mubr.msk.f32.vlgmr.msra.gmra.mrb[4].mxu0 %vm116_vm2, %v490_v0 }
 0x546   :  { %v565_v1 = vpop.f32.mrb[4].mxu1 }
 0x547   :  { %v780_v2 = vpop.f32.mrb[5].mxu1 }
 0x5b9   :  { %v638_v4 = vpop.f32.mrb[4].mxu0 }
 0x5ba   :  { %v639_v5 = vadd.f32 %v638_v4, %v565_v1  ;;  %v787_v6 = vpop.f32.mrb[5].mxu0 }
 0x5bc   :  { %v648_v7 = vadd.f32 %v732_v3, %v639_v5 }
 0x5be   :  { %831 = vtanh.f32 %v648_v7  ;;  %652 = vrot.lane.b32.xlu1 %v648_v7, %s1015_s6  ;;  %v650_v12 = vmul.f32 %v648_v7, %v1187_v26 }
 0x5c8   :  { %v832_v8 = vpop.eup %831 }
 0x5c9   :  { %663 = vrot.lane.b32.xlu0 %v832_v8, %s1005_s15 }
 0x630   :  { %v653_v11 = vpop.permute.xlu1 %652 }
 0x631   :  { %v655_v13 = vadd.f32 %v653_v11, %v650_v12 }
 0x633   :  { %v733_v14 = vmul.f32 -1.442695, %v655_v13 }
 0x635   :  { %833 = vpow2.f32 %v733_v14 }
 0x63b   :  { %v664_v9 = vpop.permute.xlu0 %663 }
 0x63c   :  { %v666_v10 = vsub.f32 %v832_v8, %v664_v9 }
 0x63e   :  { %668 = vrot.lane.b32.xlu0 %v666_v10, %s1005_s15  ;;  %s1017_s15 = smov 32  }
 0x63f   :  { %v834_v15 = vpop.eup %833 }
 0x640   :  { %v659_v16 = vadd.f32 1.0, %v834_v15 }
 0x642   :  { %677 = vrot.lane.b32.xlu0 %v490_v0, %s1013_s19  ;;  %835 = vrcp.f32 %v659_v16 }
 0x64c   :  { %v836_v17 = vpop.eup %835 }
 0x6b0   :  { %v669_v18 = vpop.permute.xlu0 %668 }
 0x6b1   :  { %v671_v19 = vmul.f32 %v836_v17, %v669_v18 }
 0x6b3   :  { %673 = vrot.lane.b32.xlu1 %v671_v19, %s1012_s18 }
 0x725   :  { %v674_v20 = vpop.permute.xlu1 %673 }
 0x726   :  { %v676_v21 = vadd.f32 %v832_v8, %v674_v20 }
 0x728   :  { %681 = vrot.lane.b32.xlu1 %v676_v21, %s1017_s15  ;;  %690 = vst.msk [vmem:[#allocation12] sm:$0xf] %vm689_vm3, %v676_v21 }
 0x729   :  { %958 = shalt.err (!%p955_p2)
}
 0x72a   :  { %s959_s17 = scalar_lea.hbm %s1268_s13, 64 }
 0x72b   :  { %p960_p3 = scmp.ne.s32.totalorder %s1268_s13, %s959_s17  ;;  %p963_p4 = scmp.lt.u32.totalorder %s959_s17, %s1268_s13 }
 0x72d   :  { %p965_p5 = pnand %p963_p4, %p960_p3 }
 0x72f   :  { %968 = shalt.err (!%p965_p5)
}
 0x730   :  { %710 = dma.vmem_to_hbm [thread:$0]  %s708_s21, 64, %s1268_s13, [#allocation13]   ;;  %v678_v22 = vpop.permute.xlu0 %677  ;;  %vm685_vm4 = vcmask 261120   ;;  %vm687_vm5 = vcmask 322560  }
 0x731   :  { %s1018_s18 = smov [#allocation11]   ;;  %v684_v23 = vsel %vm116_vm2, %v1194_v38, %v678_v22 }
 0x732   :  { %s697_s19 = sshll.u32 %s1018_s18, 4  ;;  %s698_s19 = int_to_ptr.vmem [resolvable:$true] %s697_s19 }
 0x733   :  { %s969_s20 = scalar_lea.vmem %s698_s19, 64  ;;  %p974_p7 = scmp.lt.s32.totalorder %s698_s19, %s698_s19 }
 0x734   :  { %p970_p6 = scmp.ne.s32.totalorder %s698_s19, %s969_s20  ;;  %p975_p8 = scmp.lt.s32.totalorder %s969_s20, %s969_s20 }
 0x736   :  { %p976_p9 = por %p975_p8, %p974_p7 }
 0x738   :  { %p977_p10 = pnand %p976_p9, %p970_p6 }
 0x79a   :  { %v682_v24 = vpop.permute.xlu1 %681 }
 0x79b   :  { %v686_v25 = vsel %vm685_vm4, %v684_v23, %v682_v24 }
 0x79c   :  { %688 = vst.msk [vmem:[#allocation11] sm:$0xf] %vm687_vm5, %v686_v25 }
 0x79d   :  { %980 = shalt.err (!%p977_p10)
}
 0x79e   :  { %s981_s2 = scalar_lea.hbm %s1267_s12, 64 }
 0x79f   :  { %p982_p11 = scmp.ne.s32.totalorder %s1267_s12, %s981_s2  ;;  %p985_p12 = scmp.lt.u32.totalorder %s981_s2, %s1267_s12 }
 0x7a1   :  { %p987_p13 = pnand %p985_p12, %p982_p11 }
 0x7a3   :  { %990 = shalt.err (!%p987_p13)
}
 0x7a4   :  { %700 = dma.vmem_to_hbm [thread:$0]  %s698_s19, 64, %s1267_s12, [#allocation4]  }
 0x7a5   :  { %997 = dma.done.wait [#allocation4], 64  }
 0x7a6   :  { %998 = vsyncadd [#allocation4], 4294967232 }
 0x7a7   :  { %999 = dma.done.wait [#allocation13], 64  }
 0x7a8   :  { %1000 = vsyncadd [#allocation13], 4294967232 }
 0x7a9   :  { %717 = vsyncpa [#allocation3], 1 }
 0x7aa   :  { %718 = vsyncpa [#allocation6], 1 }
 0x7ab   :  { %719 = vsyncpa [#allocation9], 1 }
 0x7ac   :  { %720 = vsyncpa [#allocation4], 1 }
 0x7ad   :  { %721 = vsyncpa [#allocation13], 1 }

</bundles_post_ra>
